<compile_context>
chip_gen: v5e
topology: v5e:2x2
jax: 0.10.0
libtpu: 0.0.40
codegen_flags: <defaults>
</compile_context>

<pallas_src>
import functools

import jax
import jax.numpy as jnp
from jax.experimental import pallas as pl
from jax.experimental.pallas import tpu as pltpu


def _grn_kernel(x_ref, gamma_ref, beta_ref, o_ref, *, eps, inv_c, chunk,
                n_chunks, rem):
    # x_ref / o_ref: (TB, C, S) in the input dtype.
    # gamma_ref / beta_ref: (C, 1) float32.
    tb, c_dim, _ = x_ref.shape

    # Chunked sum-of-squares over the spatial (lane) axis, accumulated in f32.
    # Cast is fused into the square -> no full-tile f32 temporary.
    acc = jnp.zeros((tb, c_dim, 1), jnp.float32)
    for k in range(n_chunks):
        ck = x_ref[:, :, pl.ds(k * chunk, chunk)].astype(jnp.float32)
        acc = acc + jnp.sum(ck * ck, axis=-1, keepdims=True)
    if rem:
        ck = x_ref[:, :, pl.ds(n_chunks * chunk, rem)].astype(jnp.float32)
        acc = acc + jnp.sum(ck * ck, axis=-1, keepdims=True)

    gx = jnp.sqrt(acc)                                    # (TB, C, 1) f32
    gmean = jnp.sum(gx, axis=1, keepdims=True) * inv_c    # (TB, 1, 1) f32
    nx = gx / (gmean + eps)                               # (TB, C, 1) f32

    gamma = gamma_ref[...][None, :, :]                    # (1, C, 1) f32
    beta = beta_ref[...][None, :, :]                      # (1, C, 1) f32

    # Fused apply: gamma*(x*nx) + beta + x == x*(1 + gamma*nx) + beta.
    scale = (1.0 + gamma * nx).astype(o_ref.dtype)        # (TB, C, 1)
    o_ref[...] = x_ref[...] * scale + beta.astype(o_ref.dtype)


def _vmem_capacity_bytes():
    try:
        info = pltpu.get_tpu_info()
        cap = getattr(info, "vmem_capacity_bytes", None)
        if cap:
            return int(cap)
    except Exception:
        pass
    return 64 * 1024 * 1024  # conservative (v7x-sized) fallback


def _is_v5e():
    try:
        kind = jax.devices()[0].device_kind.lower()
        return ("v5 lite" in kind) or ("v5lite" in kind) or ("v5e" in kind)
    except Exception:
        return False


def grn_channel_first(x, gamma, beta, eps=1e-6):
    """GRN forward ('channel_first'), x: (B, C, H, W) like the PyTorch module."""
    B, C, H, W = x.shape
    S = H * W
    dtype = x.dtype
    itemsize = jnp.dtype(dtype).itemsize

    # Internal VMEM layout padding (used ONLY for budgeting; no HBM padding).
    sublane = {4: 8, 2: 16, 1: 32}.get(itemsize, 8)
    C_eff = pl.cdiv(C, sublane) * sublane
    S_eff = pl.cdiv(S, 128) * 128
    bytes_per_b = C_eff * S_eff * itemsize

    vmem_cap = _vmem_capacity_bytes()
    vmem_budget = min(vmem_cap * 3 // 4, 96 << 20)        # ~48 MiB on v7x, 96 MiB on v5e/v6e

    # Per-generation tile target: ~2 MiB on v5e, ~6 MiB on v6e/v7x.
    tile_target = (2 << 20) if _is_v5e() else (6 << 20)

    TB = max(1, tile_target // bytes_per_b)
    TB = min(TB, max(1, B // 8))                          # >= ~8 grid steps when B allows
    TB = min(TB, B)

    # Fit double-buffered in+out tiles (+slack) into the VMEM budget;
    # fall back to single buffering before giving up.
    buffer_count = 2
    max_tb = (vmem_budget - (4 << 20)) // (2 * buffer_count * bytes_per_b)
    if max_tb < 1:
        buffer_count = 1
        max_tb = (vmem_budget - (4 << 20)) // (2 * buffer_count * bytes_per_b)
        if max_tb < 1:
            # TODO(synk): spatially-tiled two-pass fallback for very large C*H*W.
            raise NotImplementedError(
                "GRN: a single batch element does not fit VMEM even single-buffered")
    TB = int(max(1, min(TB, max_tb)))
    grid = (pl.cdiv(B, TB),)

    # Lane-chunk for the f32 reduction: keep the live f32 chunk ~<= 512 KiB,
    # but cap the unroll count.
    chunk = (512 * 1024) // max(1, TB * C_eff * 4)
    chunk = max(128, (chunk // 128) * 128)
    chunk = min(chunk, S_eff)
    max_unroll = 16
    if chunk * max_unroll < S:
        chunk = pl.cdiv(pl.cdiv(S, max_unroll), 128) * 128
    n_chunks = S // chunk
    rem = S - n_chunks * chunk

    vmem_bytes = int(min(vmem_budget,
                         max(2 * buffer_count * TB * bytes_per_b + (4 << 20),
                             16 << 20)))

    x_flat = x.reshape(B, C, S)                           # free (contiguous)
    gamma2 = gamma.astype(jnp.float32).reshape(C, 1)
    beta2 = beta.astype(jnp.float32).reshape(C, 1)

    kernel = functools.partial(_grn_kernel, eps=float(eps), inv_c=1.0 / C,
                               chunk=int(chunk), n_chunks=int(n_chunks),
                               rem=int(rem))

    def _io_spec(shape, index_map):
        if buffer_count == 2:
            return pl.BlockSpec(shape, index_map)
        return pl.BlockSpec(shape, index_map,
                            pipeline_mode=pl.Buffered(buffer_count))

    out = pl.pallas_call(
        kernel,
        out_shape=jax.ShapeDtypeStruct((B, C, S), dtype),
        grid_spec=pltpu.PrefetchScalarGridSpec(
            num_scalar_prefetch=0,
            grid=grid,
            in_specs=[
                _io_spec((TB, C, S), lambda b: (b, 0, 0)),
                pl.BlockSpec((C, 1), lambda b: (0, 0)),
                pl.BlockSpec((C, 1), lambda b: (0, 0)),
            ],
            out_specs=_io_spec((TB, C, S), lambda b: (b, 0, 0)),
        ),
        compiler_params=pltpu.CompilerParams(
            dimension_semantics=("parallel",),
            vmem_limit_bytes=vmem_bytes,
        ),
    )(x_flat, gamma2, beta2)

    return out.reshape(B, C, H, W)


def grn_reference(x, gamma, beta, eps=1e-6):
    # Pure-JAX reference mirroring the PyTorch channel_first branch.
    gx = jnp.sqrt(jnp.sum(x * x, axis=(2, 3), keepdims=True))       # (B,C,1,1)
    nx = gx / (jnp.mean(gx, axis=1, keepdims=True) + eps)           # (B,C,1,1)
    return gamma.reshape(1, -1, 1, 1) * (x * nx) + beta.reshape(1, -1, 1, 1) + x


if __name__ == "__main__":
    key = jax.random.PRNGKey(0)
    kx, kg, kb = jax.random.split(key, 3)

    B, C, H, W = 2, 4, 16, 16
    x = jax.random.normal(kx, (B, C, H, W), dtype=jnp.float32)
    # Module inits gamma/beta to zeros; use small random values so the kernel's
    # compute path is actually exercised (shapes match nn.Parameter(C,)).
    gamma = 0.1 * jax.random.normal(kg, (C,), dtype=jnp.float32)
    beta = 0.1 * jax.random.normal(kb, (C,), dtype=jnp.float32)

    y = jax.block_until_ready(grn_channel_first(x, gamma, beta))

    y_ref = grn_reference(x, gamma, beta)
    assert jnp.allclose(y, y_ref, atol=1e-5, rtol=1e-5), "mismatch vs reference"

    print("KERNEL_OK")
</pallas_src>

<mosaic_0001>
module attributes {stable_mosaic.version = 11 : i64} {
  func.func @_grn_kernel(%arg0: i32, %arg1: memref<1x4x256xf32, #tpu.memory_space<vmem>>, %arg2: memref<4x1xf32, #tpu.memory_space<vmem>>, %arg3: memref<4x1xf32, #tpu.memory_space<vmem>>, %arg4: memref<1x4x256xf32, #tpu.memory_space<vmem>>) attributes {dimension_semantics = [#tpu.dimension_semantics<parallel>], iteration_bounds = array<i64: 2>, scalar_prefetch = 0 : i64, scratch_operands = 0 : i64, tpu.core_type = #tpu.core_type<tc>, window_params = [{transform_indices = @transform_0, window_bounds = array<i64: 1, 4, 256>}, {pipeline_mode = #tpu.pipeline_mode<synchronous>, transform_indices = @transform_1, window_bounds = array<i64: 4, 1>}, {pipeline_mode = #tpu.pipeline_mode<synchronous>, transform_indices = @transform_2, window_bounds = array<i64: 4, 1>}, {transform_indices = @transform_3, window_bounds = array<i64: 1, 4, 256>}]} {
    %cst = arith.constant 0.000000e+00 : f32
    %0 = vector.broadcast %cst : f32 to vector<1x4x1xf32>
    %c0 = arith.constant 0 : index
    %c0_0 = arith.constant 0 : index
    %c0_1 = arith.constant 0 : index
    %1 = vector.load %arg1[%c0, %c0_0, %c0_1] : memref<1x4x256xf32, #tpu.memory_space<vmem>>, vector<1x4x256xf32>
    %2 = arith.mulf %1, %1 : vector<1x4x256xf32>
    %cst_2 = arith.constant dense<0.000000e+00> : vector<1x4xf32>
    %3 = vector.multi_reduction <add>, %2, %cst_2 [2] : vector<1x4x256xf32> to vector<1x4xf32>
    %4 = vector.shape_cast %3 : vector<1x4xf32> to vector<1x4x1xf32>
    %5 = arith.addf %0, %4 : vector<1x4x1xf32>
    %6 = math.sqrt %5 : vector<1x4x1xf32>
    %cst_3 = arith.constant dense<0.000000e+00> : vector<1x1xf32>
    %7 = vector.multi_reduction <add>, %6, %cst_3 [1] : vector<1x4x1xf32> to vector<1x1xf32>
    %8 = vector.shape_cast %7 : vector<1x1xf32> to vector<1x1x1xf32>
    %cst_4 = arith.constant 2.500000e-01 : f32
    %9 = vector.broadcast %cst_4 : f32 to vector<1x1x1xf32>
    %10 = arith.mulf %8, %9 : vector<1x1x1xf32>
    %cst_5 = arith.constant 9.99999997E-7 : f32
    %11 = vector.broadcast %cst_5 : f32 to vector<1x1x1xf32>
    %12 = arith.addf %10, %11 : vector<1x1x1xf32>
    %13 = vector.broadcast %12 : vector<1x1x1xf32> to vector<1x4x1xf32>
    %14 = arith.divf %6, %13 : vector<1x4x1xf32>
    %c0_6 = arith.constant 0 : index
    %c0_7 = arith.constant 0 : index
    %15 = vector.load %arg2[%c0_6, %c0_7] : memref<4x1xf32, #tpu.memory_space<vmem>>, vector<4x1xf32>
    %16 = vector.shape_cast %15 : vector<4x1xf32> to vector<1x4x1xf32>
    %c0_8 = arith.constant 0 : index
    %c0_9 = arith.constant 0 : index
    %17 = vector.load %arg3[%c0_8, %c0_9] : memref<4x1xf32, #tpu.memory_space<vmem>>, vector<4x1xf32>
    %18 = vector.shape_cast %17 : vector<4x1xf32> to vector<1x4x1xf32>
    %19 = arith.mulf %16, %14 : vector<1x4x1xf32>
    %cst_10 = arith.constant 1.000000e+00 : f32
    %20 = vector.broadcast %cst_10 : f32 to vector<1x4x1xf32>
    %21 = arith.addf %20, %19 : vector<1x4x1xf32>
    %c0_11 = arith.constant 0 : index
    %c0_12 = arith.constant 0 : index
    %c0_13 = arith.constant 0 : index
    %22 = vector.load %arg1[%c0_11, %c0_12, %c0_13] : memref<1x4x256xf32, #tpu.memory_space<vmem>>, vector<1x4x256xf32>
    %23 = vector.broadcast %21 : vector<1x4x1xf32> to vector<1x4x256xf32>
    %24 = arith.mulf %22, %23 : vector<1x4x256xf32>
    %25 = vector.broadcast %18 : vector<1x4x1xf32> to vector<1x4x256xf32>
    %26 = arith.addf %24, %25 : vector<1x4x256xf32>
    %c0_14 = arith.constant 0 : index
    %c0_15 = arith.constant 0 : index
    %c0_16 = arith.constant 0 : index
    %27 = vector.load %arg4[%c0_14, %c0_15, %c0_16] : memref<1x4x256xf32, #tpu.memory_space<vmem>>, vector<1x4x256xf32>
    tpu.vector_store %arg4[%c0_14, %c0_15, %c0_16], %26 {strides = array<i32>} : memref<1x4x256xf32, #tpu.memory_space<vmem>>, vector<1x4x256xf32>,
    return
  }
  func.func @transform_0(%arg0: i32) -> (i32, i32, i32) {
    %c0_i32 = arith.constant 0 : i32
    %c0_i32_0 = arith.constant 0 : i32
    %c0_i32_1 = arith.constant 0 : i32
    return %arg0, %c0_i32, %c0_i32_0 : i32, i32, i32
  }
  func.func @transform_1(%arg0: i32) -> (i32, i32) {
    %c0_i32 = arith.constant 0 : i32
    %c0_i32_0 = arith.constant 0 : i32
    %c0_i32_1 = arith.constant 0 : i32
    return %c0_i32, %c0_i32_0 : i32, i32
  }
  func.func @transform_2(%arg0: i32) -> (i32, i32) {
    %c0_i32 = arith.constant 0 : i32
    %c0_i32_0 = arith.constant 0 : i32
    %c0_i32_1 = arith.constant 0 : i32
    return %c0_i32, %c0_i32_0 : i32, i32
  }
  func.func @transform_3(%arg0: i32) -> (i32, i32, i32) {
    %c0_i32 = arith.constant 0 : i32
    %c0_i32_0 = arith.constant 0 : i32
    %c0_i32_1 = arith.constant 0 : i32
    return %arg0, %c0_i32, %c0_i32_0 : i32, i32, i32
  }
}

</mosaic_0001>

<bundles_post_ra>
// kernel: tpu_custom_call.1
= control target key start
LH: loop header
LB: loop body
LE: loop exit
PB: predicated region body
PF: predicated region fallthrough
CT: control target
= control target key end

     0   :  { %8 = vsyncpa [#allocation3], 0  ;;  %s687_s0 = inlined_call_operand.hbm [shape: f32[2,4,256], index: 0, kind: input, shape index: {}]   ;;  %s688_s1 = inlined_call_operand.vmem [shape: f32[4,1], index: 1, kind: input, shape index: {}]   ;;  %s689_s2 = inlined_call_operand.vmem [shape: f32[4,1], index: 2, kind: input, shape index: {}]   ;;  %s690_s3 = inlined_call_operand.hbm [shape: f32[2,4,256], index: 3, kind: output, shape index: {}]  }
   0x1   :  { %10 = vsyncpa [#allocation3 + $0x1], 0 }
   0x2   :  { %11 = vsyncpa [#allocation4], 0 }
   0x3   :  { %13 = vsyncpa [#allocation4 + $0x1], 0  ;;  %s542_s12 = smov 0   ;;  %s544_s13 = smov 0  }
   0x4   :  { %s546_s14 = smov 0   ;;  %s548_s15 = smov 0  }
   0x5 LB: > { %s563_s16 = sadd.s32 4294967295, %s518_s15   ;;  %s352_s17 = sadd.s32 4294967294, %s518_s15   ;;  %s518_s15 = sphi %s548_s15, %s700_s15   ;;  %s514_s14 = sphi %s546_s14, %s699_s14   ;;  %s510_s13 = sphi %s544_s13, %s698_s13   ;;  %s506_s12 = sphi %s542_s12, %s697_s12  }
   0x6   : > { %s567_s18 = sadd.s32 1, %s518_s15   ;;  %s26_s19 = sadd.s32 1, %s514_s14 }
   0x7   : > { %s23_s20 = ssub.s32 %s518_s15, %s567_s18  ;;  %p33_p0 = scmp.ne.s32.totalorder %s514_s14, %s510_s13 }
   0x8   : > { %p24_p1 = scmp.eq.s32.totalorder %s23_s20, 0  ;;  %p34_p2 = scmp.eq.s32.totalorder %s518_s15, 0 }
   0x9   : > { %p39_p3 = scmp.ne.s32.totalorder %s510_s13, %s506_s12  ;;  %p40_p4 = scmp.eq.s32.totalorder %s563_s16, 0 }
   0xa   : > { %s579_s21 = scalar_select %p24_p1, %s514_s14, %s26_s19  }
   0xb   : > { %p581_p5 = por %p34_p2, %p33_p0  ;;  %p585_p6 = por %p40_p4, %p39_p3 }
   0xc   : > { %p105_p7 = scmp.eq.s32.totalorder %s563_s16, 1  ;;  %p111_p8 = scmp.eq.s32.totalorder %s352_s17, 1 }
   0xd   : > { %p380_p10 = scmp.lt.s32.totalorder %s518_s15, 2  ;;  %s137_s26 = sand.u32 1, %s514_s14  }
   0xe   : > { %p592_p11 = por %p105_p7, %p33_p0  ;;  %p596_p12 = por %p111_p8, %p39_p3 }
   0xf   : > { %s366_s27 = sshll.u32 %s518_s15, 3  ;;  %s355_s28 = sshll.u32 %s137_s26, 3 }
  0x10   : > { %s146_s4 = scalar_lea.hbm %s687_s0, %s366_s27  ;;  %s141_s6 = scalar_lea.vmem [#allocation2], %s355_s28 }
  0x11   : > { %s148_s5 = sshll.u32 %s146_s4, 4  ;;  %s150_s7 = sshll.u32 %s141_s6, 4  ;;  %s149_s5 = int_to_ptr.hbm [resolvable:$true] %s148_s5  ;;  %s151_s7 = int_to_ptr.vmem [resolvable:$true] %s150_s7 }
  0x12   : > { %p607_p13 = pnand %p380_p10, %p581_p5  ;;  %p358_p0 = scmp.ge.s32.totalorder %s518_s15, 1 }
  0x13   : > { %p155_p1 = scmp.lt.s32.totalorder %s518_s15, 3  ;;  %s138_s9 = scalar_lea.sflag [#allocation3], %s137_s26 }
  0x14   : > { %s422_s10 = sshra.s32 %s149_s5, 4  ;;  %p426_p3 = pneg %p607_p13  ;;  %s423_s10 = int_to_ptr.hbm [resolvable:$true] %s422_s10 }
  0x15   : > { %s424_s11 = scalar_lea.hbm %s423_s10, 8  ;;  %s429_s20 = scalar_lea.hbm %s687_s0, 16 }
  0x16   : > { %p425_p2 = scmp.ne.s32.totalorder %s423_s10, %s424_s11  ;;  %p430_p5 = scmp.lt.s32.totalorder %s423_s10, %s687_s0 }
  0x17   : > { %p431_p8 = scmp.lt.s32.totalorder %s429_s20, %s424_s11 }
  0x18   : > { %p427_p4 = pnand %p426_p3, %p425_p2 }
  0x19   : > { %p432_p10 = por %p431_p8, %p430_p5 }
  0x1a   : > { %p428_p7 = pneg %p427_p4 }
  0x1c   : > { %p433_p9 = pnand %p432_p10, %p428_p7 }
  0x1e   : > { %436 = shalt.err (!%p433_p9)
}
  0x1f   : > { %375 = dma.hbm_to_vmem [thread:$0]  (!%p607_p13), %s149_s5, 128, %s151_s7, %s138_s9  }
  0x20   : > { %p156_p2 = pnand %p358_p0, %p155_p1 }
  0x21   : > { %s628_s26 = sand.u32 (!%p156_p2), 1, %s510_s13  }
  0x22   : > { %159 = sbr.rel (%p156_p2) target bundleno = 355 (0x163), region = 32  ;;  %s359_s28 = sshll.u32 (!%p156_p2), %s628_s26, 3 }
  0x23   : > { %s162_s29 = scalar_lea.sflag (!%p156_p2), [#allocation3], %s628_s26  ;;  %s165_s30 = scalar_lea.vmem (!%p156_p2), [#allocation2], %s359_s28 }
  0x27   : > { %497 = dma.done.wait (%p585_p6), %s162_s29, 128  }
  0x28   : > { %499 = vsyncadd (%p585_p6), %s162_s29, 4294967168  ;;  %v638_v0 = vld [vmem:[%s165_s30] sm:$0xff]  ;;  %vm197_vm0 = vcmask 1043456   ;;  %v520_v7 = vmov 0   ;;  %v241_v24 = vld [vmem:[%s689_s2] sm:$0xf] }
  0x29   : > { %v190_v1 = vmul.f32 %v638_v0, %v638_v0  ;;  %416 = vset.pattern.permute.xlu0 %v520_v7  ;;  %417 = vset.pattern.permute.xlu1 %v520_v7  ;;  %v240_v39 = vld [vmem:[%s688_s1] sm:$0xf]  ;;  %v521_v43 = vmov 839922192   ;;  %s367_s7 = sshll.u32 %s563_s16, 3  ;;  %s188_s11 = scalar_lea.vmem [#allocation5], %s359_s28 }
  0x2a   : > { %256 = vperm.xlu1 %417, %v241_v24   ;;  %v249_v44 = vunpack.c.l.s4 %v521_v43  ;;  %s277_s10 = scalar_lea.hbm %s690_s3, %s367_s7  ;;  %s279_s17 = sshll.u32 %s188_s11, 4  ;;  %s280_s17 = int_to_ptr.vmem [resolvable:$true] %s279_s17 }
  0x2b   : > { %192 = vst [vmem:[#allocation1] ss:$2 sm:$0xff] %v190_v1  ;;  %s281_s19 = sshll.u32 %s277_s10, 4  ;;  %s266_s16 = scalar_lea.sflag [#allocation4], %s628_s26  ;;  %s282_s19 = int_to_ptr.hbm [resolvable:$true] %s281_s19 }
  0x2c   : > { %v250_v45 = vunpack.c.0.s8 %v249_v44  ;;  %s466_s20 = sshra.s32 %s282_s19, 4  ;;  %s472_s28 = scalar_lea.hbm %s690_s3, 16  ;;  %s467_s20 = int_to_ptr.hbm [resolvable:$true] %s466_s20 }
  0x2d   : > { %s468_s22 = scalar_lea.hbm %s467_s20, 8  ;;  %p473_p0 = scmp.lt.s32.totalorder %s467_s20, %s690_s3 }
  0x2e   : > { %p469_p6 = scmp.ne.s32.totalorder %s467_s20, %s468_s22  ;;  %p474_p1 = scmp.lt.s32.totalorder %s472_s28, %s468_s22 }
  0x30   : > { %p470_p9 = pnand %p469_p6, %p592_p11  ;;  %p475_p3 = por %p474_p1, %p473_p0 }
  0x32   : > { %v193_v2 = vld.sshfl [vmem:[#allocation1] sm:$0xff pattern:$0x75316420]  ;;  %v194_v3 = vld.sshfl [vmem:[#allocation1 + $0x8] sm:$0xff pattern:$0x75316420]  ;;  %p471_p13 = pneg %p470_p9 }
  0x33   : > { %v198_v4 = vsel %vm197_vm0, %v193_v2, 0.0  ;;  %v199_v5 = vsel %vm197_vm0, %v194_v3, 0.0 }
  0x34   : > { %v200_v6 = vadd.f32 %v199_v5, %v198_v4  ;;  %p476_p4 = pnand %p475_p3, %p471_p13 }
  0x36   : > { %201 = vadd.xlane.f32.xlu0 %v200_v6 }
  0x9c   : > { %v257_v46 = vpop.permute.xlu1 %256 }
  0x9d   : > { %v261_v49 = vperm.slane %v257_v46, %v250_v45 }
  0xa9   : > { %v202_v8 = vpop.xlane.xlu0 %201 }
  0xaa   : > { %418 = vrsqrt.f32 %v202_v8  ;;  %vm211_vm1 = vcmp.eq.f32.partialorder %v202_v8, inf  ;;  %v214_v16 = vand.u32 2147483648, %v202_v8  ;;  %vm213_vm2 = vcmp.eq.f32.partialorder %v202_v8, 0.0 }
  0xb0   : > { %v419_v9 = vpop.eup %418 }
  0xb1   : > { %v205_v10 = vmul.f32 %v419_v9, %v202_v8 }
  0xb3   : > { %v206_v11 = vmul.f32 %v419_v9, %v205_v10 }
  0xb5   : > { %v207_v12 = vmul.f32 0.5, %v206_v11 }
  0xb7   : > { %v208_v13 = vsub.f32 1.5, %v207_v12 }
  0xb9   : > { %v209_v14 = vmul.f32 %v419_v9, %v208_v13 }
  0xbb   : > { %v210_v15 = vmul.f32 %v209_v14, %v202_v8 }
  0xbd   : > { %v212_v17 = vsel %vm211_vm1, %v202_v8, %v210_v15 }
  0xbe   : > { %v215_v18 = vsel %vm213_vm2, %v214_v16, %v212_v17 }
  0xbf   : > { %v216_v19 = vsel %vm197_vm0, %v215_v18, 0.0 }
  0xc0   : > { %v217_v20 = vrot.slane %v216_v19, 4 }
  0xc2   : > { %v218_v21 = vadd.f32 %v217_v20, %v216_v19 }
  0xc4   : > { %v219_v22 = vrot.slane %v218_v21, 2 }
  0xc6   : > { %v220_v23 = vadd.f32 %v219_v22, %v218_v21 }
  0xc8   : > { %v221_v25 = vrot.slane %v220_v23, 1 }
  0xca   : > { %v222_v26 = vadd.f32 %v221_v25, %v220_v23 }
  0xcc   : > { %v223_v27 = vmul.f32 0.25, %v222_v26 }
  0xce   : > { %v224_v28 = vadd.f32 1e-06, %v223_v27 }
  0xd0   : > { %420 = vrcp.f32 %v224_v28  ;;  %v236_v32 = vand.u32 2147483648, %v224_v28  ;;  %v234_v34 = vand.u32 2147483647, %v224_v28  ;;  %vm230_vm4 = vweird.f32 %v224_v28 }
  0xd2   : > { %v237_v36 = vor.u32 1.1754944e-38, %v236_v32  ;;  %vm235_vm6 = vcmp.eq.f32.partialorder %v234_v34, 8.507059e+37 }
  0xd6   : > { %v421_v29 = vpop.eup %420 }
  0xd7   : > { %v226_v30 = vmul.f32 %v421_v29, %v224_v28  ;;  %vm231_vm3 = vweird.f32 %v421_v29 }
  0xd8   : > { %vm232_vm5 = vmor %vm230_vm4, %vm231_vm3 }
  0xd9   : > { %v227_v31 = vsub.f32 1.0, %v226_v30 }
  0xdb   : > { %v228_v33 = vmul.f32 %v421_v29, %v227_v31 }
  0xdd   : > { %v229_v35 = vadd.f32 %v421_v29, %v228_v33 }
  0xdf   : > { %v233_v37 = vsel %vm232_vm5, %v421_v29, %v229_v35 }
  0xe0   : > { %v238_v38 = vsel %vm235_vm6, %v237_v36, %v233_v37 }
  0xe1   : > { %v239_v40 = vmul.f32 %v238_v38, %v215_v18 }
  0xe3   : > { %v242_v41 = vmul.f32 %v240_v39, %v239_v40 }
  0xe5   : > { %v243_v42 = vadd.f32 1.0, %v242_v41 }
  0xe7   : > { %246 = vperm.xlu0 %416, %v243_v42  }
 0x159   : > { %v247_v47 = vpop.permute.xlu0 %246 }
 0x15a   : > { %v251_v48 = vperm.slane %v247_v47, %v250_v45 }
 0x15c   : > { %v253_v50 = vmul.f32 %v251_v48, %v638_v0 }
 0x15e   : > { %v263_v51 = vadd.f32 %v261_v49, %v253_v50 }
 0x160   : > { %264 = vst [vmem:[%s188_s11] sm:$0xff] %v263_v51 }
 0x161   : > { %479 = shalt.err (!%p476_p4)
}
 0x162   : > { %370 = dma.vmem_to_hbm [thread:$0]  (%p592_p11), %s280_s17, 128, %s282_s19, %s266_s16  }
 0x163 PF: > { %s293_s26 = sand.u32 1, %s506_s12   ;;  %p696_p7 = scmp.ge.s32.totalorder %s518_s15, 2 }
 0x164   : > { %s294_s4 = scalar_lea.sflag [#allocation4], %s293_s26 }
 0x165   : > { %p377_p5 = pnand %p696_p7, %p596_p12 }
 0x167   : > { %p378_p8 = pneg %p377_p5 }
 0x169   : > { %501 = dma.done.wait (%p378_p8), %s294_s4, 128  }
 0x16a   : > { %503 = vsyncadd (%p378_p8), %s294_s4, 4294967168  ;;  %p16_p10 = scmp.ge.s32.totalorder %s567_s18, 4   ;;  %s697_s12 = smov %s510_s13 }
 0x16b   : > { %s698_s13 = smov %s514_s14  ;;  %s699_s14 = smov %s579_s21 }
 0x16c   : > { %s700_s15 = smov %s567_s18  ;;  %18 = sbr.rel (!%p16_p10) target bundleno = 5 (0x5), region = 77 }
 0x171   :  { %300 = vsyncpa [#allocation3], 1 }
 0x172   :  { %302 = vsyncpa [#allocation3 + $0x1], 1 }
 0x173   :  { %303 = vsyncpa [#allocation4], 1 }
 0x174   :  { %305 = vsyncpa [#allocation4 + $0x1], 1 }

</bundles_post_ra>
